<compile_context>
chip_gen: v6e
topology: v6e:2x2x1
jax: 0.10.0
libtpu: 0.0.40
codegen_flags: <defaults>
</compile_context>

<pallas_src>
import jax
import jax.numpy as jnp
from jax.experimental import pallas as pl
from jax.experimental.pallas import tpu as pltpu


def disc_classifier_kernel(xi_ref, sc_ref, w1i_ref, w1s_ref, gamma_ref,
                           beta_ref, w2_ref, b2_ref, o_ref):
    """xi_ref: (B*S, enc) image part, NHWC-flattened; sc_ref: (B, emb);
       w1i_ref: (enc, D); w1s_ref: (emb, D); gamma/beta: (1, D);
       w2_ref: (S, D); b2_ref: (1, 1) in SMEM; o_ref: (B, 1)."""
    BS = xi_ref.shape[0]
    D = w1i_ref.shape[1]
    B = sc_ref.shape[0]
    S = w2_ref.shape[0]
    eps = 1e-5
    inv_n = 1.0 / float(BS)

    # --- 1x1 conv, fused over the whole batch (single dense MXU matmul) ----
    h_img = jnp.dot(xi_ref[...], w1i_ref[...],
                    preferred_element_type=jnp.float32)          # (B*S, D)
    h_sent = jnp.dot(sc_ref[...], w1s_ref[...],
                     preferred_element_type=jnp.float32)         # (B, D)
    # Add the sentence contribution broadcast over the spatial axis.
    h = (h_img.reshape(B, S, D) + h_sent[:, None, :]).reshape(BS, D)

    # --- BatchNorm2d (training-mode batch stats) + folded affine -----------
    mean = jnp.sum(h, axis=0, keepdims=True) * inv_n             # (1, D)
    c = h - mean
    var = jnp.sum(c * c, axis=0, keepdims=True) * inv_n          # stable form
    scale = jax.lax.rsqrt(var + eps) * gamma_ref[...]            # (1, D)
    shift = beta_ref[...] - mean * scale

    a = h * scale + shift
    a = jnp.where(a >= 0, a, 0.2 * a)                            # LeakyReLU(0.2)

    # --- feat_size x feat_size conv == full (S, D) reduction against w2 ----
    prod = a.reshape(B, S, D) * w2_ref[...][None, :, :]          # (B, S, D)
    totals = jnp.sum(jnp.sum(prod, axis=2), axis=1, keepdims=True)  # (B, 1)
    o_ref[...] = totals + b2_ref[0, 0]                           # single dense store


def prepare_params(params, enc_dim, emb_dim, feat_size):
    """One-time weight layout prep (kept out of the per-call hot path)."""
    S = feat_size * feat_size
    w1 = params["w1"][:, :, 0, 0]                                # (D, enc+emb)
    return {
        "w1_img_t": jnp.transpose(w1[:, :enc_dim]),              # (enc, D)
        "w1_sent_t": jnp.transpose(w1[:, enc_dim:]),             # (emb, D)
        "w2_t": jnp.transpose(params["w2"][0], (1, 2, 0)).reshape(S, enc_dim),
        "gamma": params["gamma"].reshape(1, enc_dim),
        "beta": params["beta"].reshape(1, enc_dim),
        "b2": params["b2"].reshape(1, 1),
    }


def disc_classifier_forward(sent_code, img_code, prep):
    B, emb_dim = sent_code.shape
    _, enc_dim, H, W = img_code.shape
    S = H * W

    # Only layout plumbing left in the wrapper: NCHW -> (B*S, enc) for the
    # image half; the sentence half stays (B, emb) and is broadcast in-kernel,
    # so no (B, emb, H, W) expand / concat is ever materialized.
    x_img = jnp.transpose(img_code, (0, 2, 3, 1)).reshape(B * S, enc_dim)

    out = pl.pallas_call(
        disc_classifier_kernel,
        out_shape=jax.ShapeDtypeStruct((B, 1), jnp.float32),
        grid_spec=pltpu.PrefetchScalarGridSpec(
            num_scalar_prefetch=0,
            grid=(1,),
            in_specs=[
                pl.BlockSpec((B * S, enc_dim), lambda i: (0, 0)),   # x_img
                pl.BlockSpec((B, emb_dim), lambda i: (0, 0)),       # sent_code
                pl.BlockSpec((enc_dim, enc_dim), lambda i: (0, 0)),  # w1_img_t
                pl.BlockSpec((emb_dim, enc_dim), lambda i: (0, 0)),  # w1_sent_t
                pl.BlockSpec((1, enc_dim), lambda i: (0, 0)),        # gamma
                pl.BlockSpec((1, enc_dim), lambda i: (0, 0)),        # beta
                pl.BlockSpec((S, enc_dim), lambda i: (0, 0)),        # w2_t
                pl.BlockSpec(memory_space=pltpu.MemorySpace.SMEM),   # b2 scalar
            ],
            out_specs=pl.BlockSpec((B, 1), lambda i: (0, 0)),
        ),
        compiler_params=pltpu.CompilerParams(
            dimension_semantics=("arbitrary",)),
    )(x_img, sent_code, prep["w1_img_t"], prep["w1_sent_t"],
      prep["gamma"], prep["beta"], prep["w2_t"], prep["b2"])
    return out


def reference_forward(sent_code, img_code, params):
    """Pure-JAX reference matching the PyTorch module."""
    B, emb_dim = sent_code.shape
    _, enc_dim, H, W = img_code.shape
    sent_b = jnp.broadcast_to(sent_code[:, :, None, None], (B, emb_dim, H, W))
    comp = jnp.concatenate([img_code, sent_b], axis=1)           # (B, Cin, H, W)
    w1 = params["w1"][:, :, 0, 0]                                # (D, Cin)
    h = jnp.einsum("bchw,dc->bdhw", comp, w1,
                   precision=jax.lax.Precision.HIGHEST)
    mean = jnp.mean(h, axis=(0, 2, 3), keepdims=True)
    var = jnp.mean((h - mean) ** 2, axis=(0, 2, 3), keepdims=True)
    hn = (h - mean) * jax.lax.rsqrt(var + 1e-5)
    hn = hn * params["gamma"][None, :, None, None] + params["beta"][None, :, None, None]
    a = jnp.where(hn >= 0, hn, 0.2 * hn)
    out = jnp.einsum("bdhw,dhw->b", a, params["w2"][0],
                     precision=jax.lax.Precision.HIGHEST) + params["b2"][0]
    return out[:, None]                                          # (B, 1)


if __name__ == "__main__":
    # Small, module-consistent shapes.
    B, enc_dim, emb_dim, feat_size = 2, 32, 16, 8
    H = W = feat_size
    Cin = enc_dim + emb_dim

    key = jax.random.PRNGKey(0)
    k_sent, k_img, k_w1, k_w2, k_b2 = jax.random.split(key, 5)

    sent_code = jax.random.normal(k_sent, (B, emb_dim), jnp.float32)
    img_code = jax.random.normal(k_img, (B, enc_dim, H, W), jnp.float32)

    params = {
        # Conv2d(Cin -> enc_dim, k=1, bias=False)
        "w1": 0.05 * jax.random.normal(k_w1, (enc_dim, Cin, 1, 1), jnp.float32),
        # BatchNorm2d(enc_dim) affine params (default init)
        "gamma": jnp.ones((enc_dim,), jnp.float32),
        "beta": jnp.zeros((enc_dim,), jnp.float32),
        # Conv2d(enc_dim -> 1, k=feat_size, bias=True)
        "w2": 0.05 * jax.random.normal(k_w2, (1, enc_dim, feat_size, feat_size),
                                       jnp.float32),
        "b2": 0.1 * jax.random.normal(k_b2, (1,), jnp.float32),
    }

    prep = prepare_params(params, enc_dim, emb_dim, feat_size)   # one-time prep
    out = disc_classifier_forward(sent_code, img_code, prep)
    out = jax.block_until_ready(out)

    ref = reference_forward(sent_code, img_code, params)
    assert out.shape == (B, 1), out.shape
    assert jnp.allclose(out, ref, rtol=1e-3, atol=1e-3), (out, ref)

    print("KERNEL_OK")
</pallas_src>

<mosaic_0001>
module attributes {stable_mosaic.version = 11 : i64} {
  func.func @disc_classifier_kernel(%arg0: i32, %arg1: memref<128x32xf32, #tpu.memory_space<vmem>>, %arg2: memref<2x16xf32, #tpu.memory_space<vmem>>, %arg3: memref<32x32xf32, #tpu.memory_space<vmem>>, %arg4: memref<16x32xf32, #tpu.memory_space<vmem>>, %arg5: memref<1x32xf32, #tpu.memory_space<vmem>>, %arg6: memref<1x32xf32, #tpu.memory_space<vmem>>, %arg7: memref<64x32xf32, #tpu.memory_space<vmem>>, %arg8: memref<1x1xf32, #tpu.memory_space<smem>>, %arg9: memref<2x1xf32, #tpu.memory_space<vmem>>) attributes {dimension_semantics = [#tpu.dimension_semantics<arbitrary>], iteration_bounds = array<i64: 1>, scalar_prefetch = 0 : i64, scratch_operands = 0 : i64, tpu.core_type = #tpu.core_type<tc>, window_params = [{pipeline_mode = #tpu.pipeline_mode<synchronous>, transform_indices = @transform_0, window_bounds = array<i64: 128, 32>}, {pipeline_mode = #tpu.pipeline_mode<synchronous>, transform_indices = @transform_1, window_bounds = array<i64: 2, 16>}, {pipeline_mode = #tpu.pipeline_mode<synchronous>, transform_indices = @transform_2, window_bounds = array<i64: 32, 32>}, {pipeline_mode = #tpu.pipeline_mode<synchronous>, transform_indices = @transform_3, window_bounds = array<i64: 16, 32>}, {pipeline_mode = #tpu.pipeline_mode<synchronous>, transform_indices = @transform_4, window_bounds = array<i64: 1, 32>}, {pipeline_mode = #tpu.pipeline_mode<synchronous>, transform_indices = @transform_5, window_bounds = array<i64: 1, 32>}, {pipeline_mode = #tpu.pipeline_mode<synchronous>, transform_indices = @transform_6, window_bounds = array<i64: 64, 32>}, {transform_indices = @transform_7, window_bounds = array<i64: 1, 1>}, {pipeline_mode = #tpu.pipeline_mode<synchronous>, transform_indices = @transform_8, window_bounds = array<i64: 2, 1>}]} {
    %c0 = arith.constant 0 : index
    %c0_0 = arith.constant 0 : index
    %0 = vector.load %arg1[%c0, %c0_0] : memref<128x32xf32, #tpu.memory_space<vmem>>, vector<128x32xf32>
    %c0_1 = arith.constant 0 : index
    %c0_2 = arith.constant 0 : index
    %1 = vector.load %arg3[%c0_1, %c0_2] : memref<32x32xf32, #tpu.memory_space<vmem>>, vector<32x32xf32>
    %cst = arith.constant dense<0.000000e+00> : vector<128x32xf32>
    %2 = tpu.matmul %0, %1, %cst {dimension_numbers = #tpu.dot_dimension_numbers<[1], [0], [0], [1], [0, 0, 1, 1], [], []>} : vector<128x32xf32>, vector<32x32xf32>, vector<128x32xf32> -> vector<128x32xf32>
    %c0_3 = arith.constant 0 : index
    %c0_4 = arith.constant 0 : index
    %3 = vector.load %arg2[%c0_3, %c0_4] : memref<2x16xf32, #tpu.memory_space<vmem>>, vector<2x16xf32>
    %c0_5 = arith.constant 0 : index
    %c0_6 = arith.constant 0 : index
    %4 = vector.load %arg4[%c0_5, %c0_6] : memref<16x32xf32, #tpu.memory_space<vmem>>, vector<16x32xf32>
    %cst_7 = arith.constant dense<0.000000e+00> : vector<2x32xf32>
    %5 = tpu.matmul %3, %4, %cst_7 {dimension_numbers = #tpu.dot_dimension_numbers<[1], [0], [0], [1], [0, 0, 1, 1], [], []>} : vector<2x16xf32>, vector<16x32xf32>, vector<2x32xf32> -> vector<2x32xf32>
    %6 = vector.shape_cast %2 : vector<128x32xf32> to vector<2x64x32xf32>
    %7 = vector.shape_cast %5 : vector<2x32xf32> to vector<2x1x32xf32>
    %8 = vector.broadcast %7 : vector<2x1x32xf32> to vector<2x64x32xf32>
    %9 = arith.addf %6, %8 : vector<2x64x32xf32>
    %10 = vector.shape_cast %9 : vector<2x64x32xf32> to vector<128x32xf32>
    %cst_8 = arith.constant dense<0.000000e+00> : vector<32xf32>
    %11 = vector.multi_reduction <add>, %10, %cst_8 [0] : vector<128x32xf32> to vector<32xf32>
    %12 = vector.shape_cast %11 : vector<32xf32> to vector<1x32xf32>
    %cst_9 = arith.constant 7.812500e-03 : f32
    %13 = vector.broadcast %cst_9 : f32 to vector<1x32xf32>
    %14 = arith.mulf %12, %13 : vector<1x32xf32>
    %15 = vector.broadcast %14 : vector<1x32xf32> to vector<128x32xf32>
    %16 = arith.subf %10, %15 : vector<128x32xf32>
    %17 = arith.mulf %16, %16 : vector<128x32xf32>
    %cst_10 = arith.constant dense<0.000000e+00> : vector<32xf32>
    %18 = vector.multi_reduction <add>, %17, %cst_10 [0] : vector<128x32xf32> to vector<32xf32>
    %19 = vector.shape_cast %18 : vector<32xf32> to vector<1x32xf32>
    %cst_11 = arith.constant 7.812500e-03 : f32
    %20 = vector.broadcast %cst_11 : f32 to vector<1x32xf32>
    %21 = arith.mulf %19, %20 : vector<1x32xf32>
    %cst_12 = arith.constant 9.99999974E-6 : f32
    %22 = vector.broadcast %cst_12 : f32 to vector<1x32xf32>
    %23 = arith.addf %21, %22 : vector<1x32xf32>
    %24 = math.rsqrt %23 : vector<1x32xf32>
    %c0_13 = arith.constant 0 : index
    %c0_14 = arith.constant 0 : index
    %25 = vector.load %arg5[%c0_13, %c0_14] : memref<1x32xf32, #tpu.memory_space<vmem>>, vector<1x32xf32>
    %26 = arith.mulf %24, %25 : vector<1x32xf32>
    %c0_15 = arith.constant 0 : index
    %c0_16 = arith.constant 0 : index
    %27 = vector.load %arg6[%c0_15, %c0_16] : memref<1x32xf32, #tpu.memory_space<vmem>>, vector<1x32xf32>
    %28 = arith.mulf %14, %26 : vector<1x32xf32>
    %29 = arith.subf %27, %28 : vector<1x32xf32>
    %30 = vector.broadcast %26 : vector<1x32xf32> to vector<128x32xf32>
    %31 = arith.mulf %10, %30 : vector<128x32xf32>
    %32 = vector.broadcast %29 : vector<1x32xf32> to vector<128x32xf32>
    %33 = arith.addf %31, %32 : vector<128x32xf32>
    %cst_17 = arith.constant 0.000000e+00 : f32
    %34 = vector.broadcast %cst_17 : f32 to vector<128x32xf32>
    %35 = arith.cmpf oge, %33, %34 : vector<128x32xf32>
    %cst_18 = arith.constant 2.000000e-01 : f32
    %36 = vector.broadcast %cst_18 : f32 to vector<128x32xf32>
    %37 = arith.mulf %36, %33 : vector<128x32xf32>
    %38 = arith.select %35, %33, %37 : vector<128x32xi1>, vector<128x32xf32>
    %39 = vector.shape_cast %38 : vector<128x32xf32> to vector<2x64x32xf32>
    %c0_19 = arith.constant 0 : index
    %c0_20 = arith.constant 0 : index
    %40 = vector.load %arg7[%c0_19, %c0_20] : memref<64x32xf32, #tpu.memory_space<vmem>>, vector<64x32xf32>
    %41 = vector.shape_cast %40 : vector<64x32xf32> to vector<1x64x32xf32>
    %42 = vector.broadcast %41 : vector<1x64x32xf32> to vector<2x64x32xf32>
    %43 = arith.mulf %39, %42 : vector<2x64x32xf32>
    %cst_21 = arith.constant dense<0.000000e+00> : vector<2x64xf32>
    %44 = vector.multi_reduction <add>, %43, %cst_21 [2] : vector<2x64x32xf32> to vector<2x64xf32>
    %cst_22 = arith.constant dense<0.000000e+00> : vector<2xf32>
    %45 = vector.multi_reduction <add>, %44, %cst_22 [1] : vector<2x64xf32> to vector<2xf32>
    %46 = vector.shape_cast %45 : vector<2xf32> to vector<2x1xf32>
    %c0_23 = arith.constant 0 : index
    %c0_24 = arith.constant 0 : index
    %47 = memref.load %arg8[%c0_23, %c0_24] : memref<1x1xf32, #tpu.memory_space<smem>>
    %48 = vector.broadcast %47 : f32 to vector<2x1xf32>
    %49 = arith.addf %46, %48 : vector<2x1xf32>
    %c0_25 = arith.constant 0 : index
    %c0_26 = arith.constant 0 : index
    %50 = vector.load %arg9[%c0_25, %c0_26] : memref<2x1xf32, #tpu.memory_space<vmem>>, vector<2x1xf32>
    tpu.vector_store %arg9[%c0_25, %c0_26], %49 {strides = array<i32>} : memref<2x1xf32, #tpu.memory_space<vmem>>, vector<2x1xf32>,
    return
  }
  func.func @transform_0(%arg0: i32) -> (i32, i32) {
    %c0_i32 = arith.constant 0 : i32
    %c0_i32_0 = arith.constant 0 : i32
    %c0_i32_1 = arith.constant 0 : i32
    return %c0_i32, %c0_i32_0 : i32, i32
  }
  func.func @transform_1(%arg0: i32) -> (i32, i32) {
    %c0_i32 = arith.constant 0 : i32
    %c0_i32_0 = arith.constant 0 : i32
    %c0_i32_1 = arith.constant 0 : i32
    return %c0_i32, %c0_i32_0 : i32, i32
  }
  func.func @transform_2(%arg0: i32) -> (i32, i32) {
    %c0_i32 = arith.constant 0 : i32
    %c0_i32_0 = arith.constant 0 : i32
    %c0_i32_1 = arith.constant 0 : i32
    return %c0_i32, %c0_i32_0 : i32, i32
  }
  func.func @transform_3(%arg0: i32) -> (i32, i32) {
    %c0_i32 = arith.constant 0 : i32
    %c0_i32_0 = arith.constant 0 : i32
    %c0_i32_1 = arith.constant 0 : i32
    return %c0_i32, %c0_i32_0 : i32, i32
  }
  func.func @transform_4(%arg0: i32) -> (i32, i32) {
    %c0_i32 = arith.constant 0 : i32
    %c0_i32_0 = arith.constant 0 : i32
    %c0_i32_1 = arith.constant 0 : i32
    return %c0_i32, %c0_i32_0 : i32, i32
  }
  func.func @transform_5(%arg0: i32) -> (i32, i32) {
    %c0_i32 = arith.constant 0 : i32
    %c0_i32_0 = arith.constant 0 : i32
    %c0_i32_1 = arith.constant 0 : i32
    return %c0_i32, %c0_i32_0 : i32, i32
  }
  func.func @transform_6(%arg0: i32) -> (i32, i32) {
    %c0_i32 = arith.constant 0 : i32
    %c0_i32_0 = arith.constant 0 : i32
    %c0_i32_1 = arith.constant 0 : i32
    return %c0_i32, %c0_i32_0 : i32, i32
  }
  func.func @transform_7(%arg0: i32) -> (i32, i32) {
    %c0_i32 = arith.constant 0 : i32
    %c0_i32_0 = arith.constant 0 : i32
    %c0_i32_1 = arith.constant 0 : i32
    return %c0_i32, %c0_i32_0 : i32, i32
  }
  func.func @transform_8(%arg0: i32) -> (i32, i32) {
    %c0_i32 = arith.constant 0 : i32
    %c0_i32_0 = arith.constant 0 : i32
    %c0_i32_1 = arith.constant 0 : i32
    return %c0_i32, %c0_i32_0 : i32, i32
  }
}

</mosaic_0001>

<bundles_post_ra>
// kernel: tpu_custom_call.1
= control target key start
LH: loop header
LB: loop body
LE: loop exit
PB: predicated region body
PF: predicated region fallthrough
CT: control target
= control target key end

     0   :  { %vm50_vm0 = vcmask 261120   ;;  %v865_v9 = vmov 0.0   ;;  %vm866_vm1 = vmmov 0   ;;  %vm247_vm2 = vcmask 130048   ;;  %s1247_s2 = inlined_call_operand.vmem [shape: f32[32,32], index: 2, kind: input, shape index: {}]   ;;  %s1248_s0 = inlined_call_operand.vmem [shape: f32[128,32], index: 0, kind: input, shape index: {}]   ;;  %s1249_s3 = inlined_call_operand.vmem [shape: f32[16,32], index: 3, kind: input, shape index: {}]   ;;  %s1250_s1 = inlined_call_operand.vmem [shape: f32[2,16], index: 1, kind: input, shape index: {}]   ;;  %s1251_s4 = inlined_call_operand.vmem [shape: f32[1,32], index: 4, kind: input, shape index: {}]   ;;  %s1252_s5 = inlined_call_operand.vmem [shape: f32[1,32], index: 5, kind: input, shape index: {}]   ;;  %s1253_s6 = inlined_call_operand.vmem [shape: f32[64,32], index: 6, kind: input, shape index: {}]   ;;  %s1254_s7 = inlined_call_operand.<no memory space> [shape: f32[1,1], index: 7, kind: input, shape index: {}]   ;;  %s1255_s8 = inlined_call_operand.vmem [shape: f32[2,1], index: 8, kind: output, shape index: {}]  }
   0x1   :  { %v49_v0 = vld [vmem:[%s1247_s2 + $0x18] sm:$0xff]  ;;  %v48_v1 = vld [vmem:[%s1247_s2 + $0x10] sm:$0xff]  ;;  %v47_v2 = vld [vmem:[%s1247_s2 + $0x8] sm:$0xff]  ;;  %v867_v25 = vmov 1966171168   ;;  %v325_v27 = vlaneseq }
   0x2   :  { %852 = vmatprep.subr.mxu1 %v49_v0  ;;  %813 = vmatprep.subr.mxu0 %v49_v0  ;;  %v40_v3 = vld [vmem:[%s1248_s0 + $0x50] sm:$0xff]  ;;  %v46_v4 = vld [vmem:[%s1247_s2] sm:$0xff]  ;;  %v41_v5 = vld [vmem:[%s1248_s0 + $0x58] sm:$0xff]  ;;  %v323_v26 = vunpack.c.l.s4 %v867_v25 }
   0x3   :  { %856 = vmatpush3.msra.mxu1 %v49_v0  ;;  %814 = vmatpush3.msra.mxu0 %v49_v0  ;;  %v246_v6 = vld [vmem:[%s1249_s3 + $0x8] sm:$0xff]  ;;  %v30_v7 = vld [vmem:[%s1248_s0] sm:$0xff]  ;;  %v32_v12 = vld [vmem:[%s1248_s0 + $0x10] sm:$0xff]  ;;  %v999_v33 = vshrl.u32 %v325_v27, 7 }
   0x4   :  { %853 = vmatprep.subr.mxu1 %v48_v1  ;;  %815 = vmatprep.subr.mxu0 %v48_v1  ;;  %v42_v8 = vld [vmem:[%s1248_s0 + $0x60] sm:$0xff]  ;;  %v31_v10 = vld [vmem:[%s1248_s0 + $0x8] sm:$0xff]  ;;  %v44_v13 = vld [vmem:[%s1248_s0 + $0x70] sm:$0xff]  ;;  %v324_v32 = vunpack.c.0.s8 %v323_v26 }
   0x5   :  { %857 = vmatpush3.msra.mxu1 %v48_v1  ;;  %816 = vmatpush3.msra.mxu0 %v48_v1  ;;  %v43_v11 = vld [vmem:[%s1248_s0 + $0x68] sm:$0xff]  ;;  %v245_v14 = vld [vmem:[%s1249_s3] sm:$0xff]  ;;  %v33_v15 = vld [vmem:[%s1248_s0 + $0x18] sm:$0xff]  ;;  %v1003_v43 = vsub.s32 0, %v999_v33 }
   0x6   :  { %854 = vmatprep.subr.mxu1 %v47_v2  ;;  %817 = vmatprep.subr.mxu0 %v47_v2  ;;  %v45_v16 = vld [vmem:[%s1248_s0 + $0x78] sm:$0xff]  ;;  %v34_v17 = vld [vmem:[%s1248_s0 + $0x20] sm:$0xff]  ;;  %v35_v18 = vld [vmem:[%s1248_s0 + $0x28] sm:$0xff]  ;;  %v327_v38 = vsub.s32 %v324_v32, %v999_v33 }
   0x7   :  { %858 = vmatpush3.msra.mxu1 %v47_v2  ;;  %836 = vmatprep.mubr.msk.f32.mxu1 %vm50_vm0, %v40_v3  ;;  %v244_v19 = vld [vmem:[%s1250_s1] sm:$0x3]  ;;  %v36_v20 = vld [vmem:[%s1248_s0 + $0x30] sm:$0xff]  ;;  %v37_v21 = vld [vmem:[%s1248_s0 + $0x38] sm:$0xff] }
   0x8   :  { %855 = vmatprep.subr.mxu1 %v46_v4  ;;  %818 = vmatpush3.msra.mxu0 %v47_v2  ;;  %v38_v22 = vld [vmem:[%s1248_s0 + $0x40] sm:$0xff]  ;;  %v39_v23 = vld [vmem:[%s1248_s0 + $0x48] sm:$0xff] }
   0x9   :  { %859 = vmatpush3.msra.mxu1 %v46_v4  ;;  %819 = vmatprep.subr.mxu0 %v46_v4 }
   0xa   :  { %837 = vmatmul.mubr.msk.f32.vlgmr.msra.gmra.mxu1 %vm50_vm0, %v41_v5  ;;  %845 = vmatprep.subr.mxu1 %v865_v9 }
   0xb   :  { %846 = vmatpush3.msra.mxu1 %v246_v6  ;;  %820 = vmatpush3.msra.mxu0 %v46_v4 }
   0xc   :  { %821 = vmatprep.mubr.msk.f32.mxu0 %vm50_vm0, %v30_v7  ;;  %839 = vmatprep.mubr.msk.f32.mxu1 %vm50_vm0, %v42_v8 }
   0xd   :  { %822 = vmatmul.mubr.msk.f32.vlgmr.msra.gmra.mxu0 %vm50_vm0, %v31_v10  ;;  %847 = vmatprep.subr.mxu1 %v865_v9 }
   0xe   :  { %840 = vmatmul.mubr.msk.f32.gmra.mxu1 %vm50_vm0, %v43_v11  ;;  %824 = vmatprep.mubr.msk.f32.mxu0 %vm50_vm0, %v32_v12 }
   0xf   :  { %842 = vmatprep.mubr.msk.f32.mxu1 %vm50_vm0, %v44_v13  ;;  %848 = vmatpush3.msra.mxu1 %v245_v14 }
  0x11   :  { %825 = vmatmul.mubr.msk.f32.gmra.mxu0 %vm50_vm0, %v33_v15 }
  0x12   :  { %843 = vmatmul.mubr.msk.f32.gmra.mxu1 %vm50_vm0, %v45_v16  ;;  %827 = vmatprep.mubr.msk.f32.mxu0 %vm50_vm0, %v34_v17 }
  0x13   :  { %849 = vmatprep.mubr.msk.f32.mxu1 %vm866_vm1, %v865_v9 }
  0x15   :  { %828 = vmatmul.mubr.msk.f32.gmra.mxu0 %vm50_vm0, %v35_v18 }
  0x16   :  { %850 = vmatmul.mubr.msk.f32.vlgmr.msra.gmra.mxu1 %vm247_vm2, %v244_v19  ;;  %830 = vmatprep.mubr.msk.f32.mxu0 %vm50_vm0, %v36_v20 }
  0x19   :  { %831 = vmatmul.mubr.msk.f32.gmra.mxu0 %vm50_vm0, %v37_v21 }
  0x1a   :  { %833 = vmatprep.mubr.msk.f32.mxu0 %vm50_vm0, %v38_v22 }
  0x1d   :  { %834 = vmatmul.mubr.msk.f32.gmra.mxu0 %vm50_vm0, %v39_v23 }
  0xca   :  { %v838_v24 = vpop.f32.mrf.mxu1 }
  0xcc   :  { %v215_v28 = vpop.f32.mrf.mxu1 }
  0xcd   :  { %v823_v29 = vpop.f32.mrf.mxu0 }
  0xce   :  { %v841_v30 = vpop.f32.mrf.mxu1 }
  0xcf   :  { %v165_v31 = vpop.f32.mrf.mxu0 }
  0xd0   :  { %v225_v34 = vpop.f32.mrf.mxu1 }
  0xd1   :  { %v826_v35 = vpop.f32.mrf.mxu0 }
  0xd2   :  { %v844_v36 = vpop.f32.mrf.mxu1 }
  0xd3   :  { %v175_v37 = vpop.f32.mrf.mxu0 }
  0xd4   :  { %v235_v39 = vpop.f32.mrf.mxu1 }
  0xd5   :  { %v829_v40 = vpop.f32.mrf.mxu0 }
  0xd6   :  { %v317_v41 = vpop.f32.mrf.mxu1 }
  0xd7   :  { %v328_v42 = vrot.slane %v317_v41, %v327_v38  ;;  %v185_v44 = vpop.f32.mrf.mxu0 }
  0xd8   :  { %v851_v45 = vpop.f32.mrf.mxu1 }
  0xd9   :  { %v336_v46 = vrot.slane %v328_v42, %v327_v38  ;;  %v832_v47 = vpop.f32.mrf.mxu0  ;;  %v329_v49 = vcombine.high %v328_v42, %v328_v42 }
  0xdb   :  { %v347_v48 = vrot.slane %v336_v46, %v1003_v43  ;;  %v195_v53 = vpop.f32.mrf.mxu0  ;;  %v343_v58 = vrot.slane %v329_v49, %v327_v38 }
  0xdd   :  { %v1006_v50 = vadd.f32 %v347_v48, %v165_v31  ;;  %v1008_v51 = vadd.f32 %v823_v29, %v347_v48  ;;  %v1010_v52 = vadd.f32 %v347_v48, %v175_v37  ;;  %v1012_v54 = vadd.f32 %v826_v35, %v347_v48  ;;  %v835_v62 = vpop.f32.mrf.mxu0 }
  0xde   :  { %v1018_v59 = vadd.f32 %v347_v48, %v185_v44  ;;  %v1024_v0 = vadd.f32 %v829_v40, %v347_v48  ;;  %v351_v2 = vrot.slane %v343_v58, %v1003_v43  ;;  %v1029_v4 = vadd.f32 %v347_v48, %v195_v53 }
  0xdf   :  { %v370_v55 = vsel %vm50_vm0, %v1006_v50, 0.0  ;;  %v371_v56 = vsel %vm50_vm0, %v1008_v51, 0.0  ;;  %v373_v60 = vsel %vm50_vm0, %v1010_v52, 0.0  ;;  %v375_v63 = vsel %vm50_vm0, %v1012_v54, 0.0  ;;  %v205_v6 = vpop.f32.mrf.mxu0 }
  0xe0   :  { %v372_v57 = vadd.f32 %v371_v56, %v370_v55  ;;  %v377_v3 = vsel %vm50_vm0, %v1018_v59, 0.0  ;;  %v1031_v7 = vadd.f32 %v832_v47, %v347_v48  ;;  %v379_v8 = vsel %vm50_vm0, %v1024_v0, 0.0 }
  0xe1   :  { %v381_v10 = vsel %vm50_vm0, %v1029_v4, 0.0  ;;  %v1037_v11 = vadd.f32 %v351_v2, %v205_v6  ;;  %v1041_v14 = vadd.f32 %v835_v62, %v351_v2  ;;  %v1043_v16 = vadd.f32 %v351_v2, %v215_v28 }
  0xe2   :  { %v374_v61 = vadd.f32 %v373_v60, %v372_v57  ;;  %v383_v13 = vsel %vm50_vm0, %v1031_v7, 0.0  ;;  %v1049_v20 = vadd.f32 %v838_v24, %v351_v2  ;;  %v1051_v22 = vadd.f32 %v351_v2, %v225_v34 }
  0xe3   :  { %v385_v17 = vsel %vm50_vm0, %v1037_v11, 0.0  ;;  %v387_v19 = vsel %vm50_vm0, %v1041_v14, 0.0  ;;  %v389_v23 = vsel %vm50_vm0, %v1043_v16, 0.0  ;;  %v1055_v26 = vadd.f32 %v841_v30, %v351_v2 }
  0xe4   :  { %v376_v1 = vadd.f32 %v375_v63, %v374_v61  ;;  %v391_v28 = vsel %vm50_vm0, %v1049_v20, 0.0  ;;  %v1059_v31 = vadd.f32 %v351_v2, %v235_v39  ;;  %v393_v32 = vsel %vm50_vm0, %v1051_v22, 0.0 }
  0xe5   :  { %v1063_v35 = vadd.f32 %v844_v36, %v351_v2  ;;  %v395_v34 = vsel %vm50_vm0, %v1055_v26, 0.0 }
  0xe6   :  { %v378_v5 = vadd.f32 %v377_v3, %v376_v1  ;;  %v397_v30 = vsel %vm50_vm0, %v1059_v31, 0.0 }
  0xe7   :  { %v399_v40 = vsel %vm50_vm0, %v1063_v35, 0.0 }
  0xe8   :  { %v380_v9 = vadd.f32 %v379_v8, %v378_v5 }
  0xea   :  { %v382_v12 = vadd.f32 %v381_v10, %v380_v9 }
  0xec   :  { %v384_v15 = vadd.f32 %v383_v13, %v382_v12 }
  0xee   :  { %v386_v18 = vadd.f32 %v385_v17, %v384_v15 }
  0xf0   :  { %v388_v21 = vadd.f32 %v387_v19, %v386_v18 }
  0xf2   :  { %v390_v25 = vadd.f32 %v389_v23, %v388_v21 }
  0xf4   :  { %v392_v29 = vadd.f32 %v391_v28, %v390_v25 }
  0xf6   :  { %v394_v24 = vadd.f32 %v393_v32, %v392_v29 }
  0xf8   :  { %v396_v37 = vadd.f32 %v395_v34, %v394_v24 }
  0xfa   :  { %v398_v38 = vadd.f32 %v397_v30, %v396_v37 }
  0xfc   :  { %v400_v41 = vadd.f32 %v399_v40, %v398_v38 }
  0xfe   :  { %v401_v39 = vrot.slane %v400_v41, 4 }
 0x100   :  { %v402_v42 = vadd.f32 %v401_v39, %v400_v41 }
 0x102   :  { %v403_v44 = vrot.slane %v402_v42, 2 }
 0x104   :  { %v404_v45 = vadd.f32 %v403_v44, %v402_v42 }
 0x106   :  { %v405_v46 = vrot.slane %v404_v45, 1 }
 0x108   :  { %v406_v47 = vadd.f32 %v405_v46, %v404_v45 }
 0x10a   :  { %v1071_v36 = vmul.f32 0.0078125, %v406_v47 }
 0x10c   :  { %v408_v48 = vsub.f32 %v1006_v50, %v1071_v36  ;;  %v409_v49 = vsub.f32 %v1008_v51, %v1071_v36  ;;  %v410_v53 = vsub.f32 %v1010_v52, %v1071_v36  ;;  %v411_v55 = vsub.f32 %v1012_v54, %v1071_v36 }
 0x10d   :  { %v412_v58 = vsub.f32 %v1018_v59, %v1071_v36  ;;  %v413_v61 = vsub.f32 %v1024_v0, %v1071_v36  ;;  %v414_v3 = vsub.f32 %v1029_v4, %v1071_v36  ;;  %v415_v9 = vsub.f32 %v1031_v7, %v1071_v36 }
 0x10e   :  { %v424_v56 = vmul.f32 %v408_v48, %v408_v48  ;;  %v425_v57 = vmul.f32 %v409_v49, %v409_v49  ;;  %v426_v60 = vmul.f32 %v410_v53, %v410_v53  ;;  %v427_v62 = vmul.f32 %v411_v55, %v411_v55 }
 0x10f   :  { %v428_v5 = vmul.f32 %v412_v58, %v412_v58  ;;  %v429_v10 = vmul.f32 %v413_v61, %v413_v61  ;;  %v416_v15 = vsub.f32 %v1037_v11, %v1071_v36  ;;  %v430_v17 = vmul.f32 %v414_v3, %v414_v3 }
 0x110   :  { %v440_v63 = vsel %vm50_vm0, %v424_v56, 0.0  ;;  %v441_v1 = vsel %vm50_vm0, %v425_v57, 0.0  ;;  %v443_v6 = vsel %vm50_vm0, %v426_v60, 0.0  ;;  %v445_v12 = vsel %vm50_vm0, %v427_v62, 0.0 }
 0x111   :  { %v442_v2 = vadd.f32 %v441_v1, %v440_v63  ;;  %v447_v18 = vsel %vm50_vm0, %v428_v5, 0.0  ;;  %v417_v21 = vsub.f32 %v1041_v14, %v1071_v36  ;;  %v431_v23 = vmul.f32 %v415_v9, %v415_v9 }
 0x112   :  { %v449_v25 = vsel %vm50_vm0, %v429_v10, 0.0  ;;  %v418_v29 = vsub.f32 %v1043_v16, %v1071_v36  ;;  %v432_v32 = vmul.f32 %v416_v15, %v416_v15  ;;  %v451_v24 = vsel %vm50_vm0, %v430_v17, 0.0 }
 0x113   :  { %v444_v8 = vadd.f32 %v443_v6, %v442_v2  ;;  %v419_v37 = vsub.f32 %v1049_v20, %v1071_v36  ;;  %v433_v30 = vmul.f32 %v417_v21, %v417_v21  ;;  %v453_v38 = vsel %vm50_vm0, %v431_v23, 0.0 }
 0x114   :  { %v420_v41 = vsub.f32 %v1051_v22, %v1071_v36  ;;  %v434_v39 = vmul.f32 %v418_v29, %v418_v29  ;;  %v455_v42 = vsel %vm50_vm0, %v432_v32, 0.0  ;;  %v421_v45 = vsub.f32 %v1055_v26, %v1071_v36  ;;  %v482_v32 = vld [vmem:[%s1252_s5] sm:$0x1] }
 0x115   :  { %v446_v13 = vadd.f32 %v445_v12, %v444_v8  ;;  %v435_v46 = vmul.f32 %v419_v37, %v419_v37  ;;  %v457_v47 = vsel %vm50_vm0, %v433_v30, 0.0  ;;  %v422_v49 = vsub.f32 %v1059_v31, %v1071_v36 }
 0x116   :  { %v436_v53 = vmul.f32 %v420_v41, %v420_v41  ;;  %v459_v55 = vsel %vm50_vm0, %v434_v39, 0.0  ;;  %v423_v57 = vsub.f32 %v1063_v35, %v1071_v36  ;;  %v437_v58 = vmul.f32 %v421_v45, %v421_v45 }
 0x117   :  { %v448_v19 = vadd.f32 %v447_v18, %v446_v13  ;;  %v461_v60 = vsel %vm50_vm0, %v435_v46, 0.0  ;;  %v438_v62 = vmul.f32 %v422_v49, %v422_v49 }
 0x118   :  { %v463_v63 = vsel %vm50_vm0, %v436_v53, 0.0  ;;  %v439_v2 = vmul.f32 %v423_v57, %v423_v57  ;;  %v465_v3 = vsel %vm50_vm0, %v437_v58, 0.0 }
 0x119   :  { %v450_v28 = vadd.f32 %v449_v25, %v448_v19  ;;  %v467_v6 = vsel %vm50_vm0, %v438_v62, 0.0  ;;  %v480_v25 = vld [vmem:[%s1251_s4] sm:$0x1] }
 0x11a   :  { %v469_v9 = vsel %vm50_vm0, %v439_v2, 0.0 }
 0x11b   :  { %v452_v34 = vadd.f32 %v451_v24, %v450_v28 }
 0x11d   :  { %v454_v40 = vadd.f32 %v453_v38, %v452_v34 }
 0x11f   :  { %v456_v44 = vadd.f32 %v455_v42, %v454_v40 }
 0x121   :  { %v458_v48 = vadd.f32 %v457_v47, %v456_v44 }
 0x123   :  { %v460_v56 = vadd.f32 %v459_v55, %v458_v48 }
 0x125   :  { %v462_v61 = vadd.f32 %v461_v60, %v460_v56 }
 0x127   :  { %v464_v1 = vadd.f32 %v463_v63, %v462_v61 }
 0x129   :  { %v466_v5 = vadd.f32 %v465_v3, %v464_v1  ;;  %v577_v3 = vld [vmem:[%s1253_s6 + $0x10] sm:$0xff] }
 0x12b   :  { %v468_v8 = vadd.f32 %v467_v6, %v466_v5 }
 0x12d   :  { %v470_v10 = vadd.f32 %v469_v9, %v468_v8 }
 0x12f   :  { %v471_v12 = vrot.slane %v470_v10, 4 }
 0x131   :  { %v472_v13 = vadd.f32 %v471_v12, %v470_v10 }
 0x133   :  { %v473_v15 = vrot.slane %v472_v13, 2 }
 0x135   :  { %v474_v17 = vadd.f32 %v473_v15, %v472_v13 }
 0x137   :  { %v475_v18 = vrot.slane %v474_v17, 1 }
 0x139   :  { %v476_v19 = vadd.f32 %v475_v18, %v474_v17 }
 0x13b   :  { %v477_v21 = vmul.f32 0.0078125, %v476_v19 }
 0x13d   :  { %v478_v23 = vadd.f32 1e-05, %v477_v21 }
 0x13f   :  { %863 = vrsqrt.f32 %v478_v23 }
 0x14c   :  { %v864_v28 = vpop.eup %863 }
 0x14d   :  { %v481_v29 = vmul.f32 %v864_v28, %v480_v25 }
 0x14f   :  { %v483_v24 = vmul.f32 %v481_v29, %v1071_v36  ;;  %v1129_v34 = vrot.slane %v481_v29, %v1003_v43 }
 0x151   :  { %v484_v37 = vsub.f32 %v482_v32, %v483_v24  ;;  %v497_v30 = vmul.f32 %v1129_v34, %v1037_v11  ;;  %v489_v38 = vmul.f32 %v1129_v34, %v1006_v50  ;;  %v498_v41 = vmul.f32 %v1129_v34, %v1041_v14 }
 0x152   :  { %v490_v39 = vmul.f32 %v1129_v34, %v1008_v51  ;;  %v499_v36 = vmul.f32 %v1129_v34, %v1043_v16  ;;  %v491_v42 = vmul.f32 %v1129_v34, %v1010_v52  ;;  %v500_v11 = vmul.f32 %v1129_v34, %v1049_v20  ;;  %v575_v52 = vld [vmem:[%s1253_s6] sm:$0xff]  ;;  %v576_v20 = vld [vmem:[%s1253_s6 + $0x8] sm:$0xff] }
 0x153   :  { %v1136_v40 = vrot.slane %v484_v37, %v1003_v43  ;;  %v492_v50 = vmul.f32 %v1129_v34, %v1012_v54  ;;  %v501_v43 = vmul.f32 %v1129_v34, %v1051_v22  ;;  %v493_v9 = vmul.f32 %v1129_v34, %v1018_v59 }
 0x154   :  { %v502_v12 = vmul.f32 %v1129_v34, %v1055_v26  ;;  %v494_v13 = vmul.f32 %v1129_v34, %v1024_v0  ;;  %v578_v26 = vld [vmem:[%s1253_s6 + $0x18] sm:$0xff] }
 0x155   :  { %v519_v14 = vadd.f32 %v1136_v40, %v497_v30  ;;  %v511_v44 = vadd.f32 %v1136_v40, %v489_v38  ;;  %v520_v51 = vadd.f32 %v1136_v40, %v498_v41  ;;  %v512_v16 = vadd.f32 %v1136_v40, %v490_v39 }
 0x156   :  { %v521_v54 = vadd.f32 %v1136_v40, %v499_v36  ;;  %v513_v22 = vadd.f32 %v1136_v40, %v491_v42  ;;  %v522_v45 = vadd.f32 %v1136_v40, %v500_v11  ;;  %v514_v46 = vadd.f32 %v1136_v40, %v492_v50 }
 0x157   :  { %vm535_vm3 = vcmp.ge.f32.partialorder %v519_v14, 0.0  ;;  %v551_v47 = vmul.f32 0.2, %v519_v14  ;;  %vm527_vm4 = vcmp.ge.f32.partialorder %v511_v44, 0.0  ;;  %v543_v48 = vmul.f32 0.2, %v511_v44 }
 0x158   :  { %vm536_vm5 = vcmp.ge.f32.partialorder %v520_v51, 0.0  ;;  %v552_v49 = vmul.f32 0.2, %v520_v51  ;;  %vm528_vm6 = vcmp.ge.f32.partialorder %v512_v16, 0.0  ;;  %v544_v53 = vmul.f32 0.2, %v512_v16 }
 0x159   :  { %v567_v55 = vsel %vm535_vm3, %v519_v14, %v551_v47  ;;  %v559_v56 = vsel %vm527_vm4, %v511_v44, %v543_v48  ;;  %vm537_vm7 = vcmp.ge.f32.partialorder %v521_v54, 0.0  ;;  %v553_v57 = vmul.f32 0.2, %v521_v54 }
 0x15a   :  { %v591_v58 = vmul.f32 %v575_v52, %v567_v55  ;;  %v583_v60 = vmul.f32 %v575_v52, %v559_v56  ;;  %v568_v61 = vsel %vm536_vm5, %v520_v51, %v552_v49  ;;  %v560_v62 = vsel %vm528_vm6, %v512_v16, %v544_v53 }
 0x15b   :  { %v592_v63 = vmul.f32 %v576_v20, %v568_v61  ;;  %v584_v1 = vmul.f32 %v576_v20, %v560_v62  ;;  %v569_v2 = vsel %vm537_vm7, %v521_v54, %v553_v57  ;;  %vm529_vm8 = vcmp.ge.f32.partialorder %v513_v22, 0.0 }
 0x15c   :  { %v623_v5 = vsel %vm50_vm0, %v591_v58, 0.0  ;;  %v599_v6 = vsel %vm50_vm0, %v583_v60, 0.0  ;;  %v545_v8 = vmul.f32 0.2, %v513_v22  ;;  %vm538_vm9 = vcmp.ge.f32.partialorder %v522_v45, 0.0  ;;  %v581_v58 = vld [vmem:[%s1253_s6 + $0x30] sm:$0xff] }
 0x15d   :  { %624 = vadd.xlane.f32.xlu1 %v623_v5  ;;  %600 = vadd.xlane.f32.xlu0 %v599_v6  ;;  %v554_v10 = vmul.f32 0.2, %v522_v45  ;;  %v593_v15 = vmul.f32 %v577_v3, %v569_v2  ;;  %vm530_vm10 = vcmp.ge.f32.partialorder %v514_v46, 0.0  ;;  %v546_v18 = vmul.f32 0.2, %v514_v46  ;;  %v582_v5 = vld [vmem:[%s1253_s6 + $0x38] sm:$0xff] }
 0x15e   :  { %v561_v17 = vsel %vm529_vm8, %v513_v22, %v545_v8  ;;  %v626_v19 = vsel %vm50_vm0, %v592_v63, 0.0  ;;  %v602_v21 = vsel %vm50_vm0, %v584_v1, 0.0  ;;  %v523_v59 = vadd.f32 %v1136_v40, %v501_v43  ;;  %v579_v43 = vld [vmem:[%s1253_s6 + $0x20] sm:$0xff] }
 0x15f   :  { %v515_v23 = vadd.f32 %v1136_v40, %v493_v9  ;;  %v585_v25 = vmul.f32 %v577_v3, %v561_v17  ;;  %v570_v28 = vsel %vm538_vm9, %v522_v45, %v554_v10  ;;  %v562_v29 = vsel %vm530_vm10, %v514_v46, %v546_v18  ;;  %v580_v46 = vld [vmem:[%s1253_s6 + $0x28] sm:$0xff] }
 0x160   :  { %v524_v0 = vadd.f32 %v1136_v40, %v502_v12  ;;  %vm539_vm11 = vcmp.ge.f32.partialorder %v523_v59, 0.0  ;;  %v555_v32 = vmul.f32 0.2, %v523_v59  ;;  %v516_v24 = vadd.f32 %v1136_v40, %v494_v13 }
 0x161   :  { %627 = vadd.xlane.f32.xlu1 %v626_v19  ;;  %603 = vadd.xlane.f32.xlu0 %v602_v21  ;;  %vm531_vm12 = vcmp.ge.f32.partialorder %v515_v23, 0.0  ;;  %v547_v37 = vmul.f32 0.2, %v515_v23  ;;  %v594_v30 = vmul.f32 %v578_v26, %v570_v28  ;;  %v586_v38 = vmul.f32 %v578_v26, %v562_v29 }
 0x162   :  { %v503_v41 = vmul.f32 %v1129_v34, %v1059_v31  ;;  %v495_v39 = vmul.f32 %v1129_v34, %v1029_v4  ;;  %v629_v36 = vsel %vm50_vm0, %v593_v15, 0.0  ;;  %v605_v42 = vsel %vm50_vm0, %v585_v25, 0.0 }
 0x163   :  { %v571_v11 = vsel %vm539_vm11, %v523_v59, %v555_v32  ;;  %v556_v50 = vmul.f32 0.2, %v524_v0  ;;  %v563_v14 = vsel %vm531_vm12, %v515_v23, %v547_v37  ;;  %v548_v44 = vmul.f32 0.2, %v516_v24 }
 0x164   :  { %v525_v51 = vadd.f32 %v1136_v40, %v503_v41  ;;  %v517_v31 = vadd.f32 %v1136_v40, %v495_v39  ;;  %vm540_vm13 = vcmp.ge.f32.partialorder %v524_v0, 0.0  ;;  %vm532_vm14 = vcmp.ge.f32.partialorder %v516_v24, 0.0 }
 0x165   :  { %630 = vadd.xlane.f32.xlu1 %v629_v36  ;;  %606 = vadd.xlane.f32.xlu0 %v605_v42  ;;  %v632_v4 = vsel %vm50_vm0, %v594_v30, 0.0  ;;  %v608_v16 = vsel %vm50_vm0, %v586_v38, 0.0  ;;  %v595_v52 = vmul.f32 %v579_v43, %v571_v11  ;;  %v587_v20 = vmul.f32 %v579_v43, %v563_v14 }
 0x166   :  { %v504_v54 = vmul.f32 %v1129_v34, %v1063_v35  ;;  %v496_v22 = vmul.f32 %v1129_v34, %v1031_v7  ;;  %v572_v45 = vsel %vm540_vm13, %v524_v0, %v556_v50  ;;  %v564_v47 = vsel %vm532_vm14, %v516_v24, %v548_v44 }
 0x167   :  { %v557_v48 = vmul.f32 0.2, %v525_v51  ;;  %v549_v49 = vmul.f32 0.2, %v517_v31  ;;  %vm541_vm15 = vcmp.ge.f32.partialorder %v525_v51, 0.0  ;;  %vm533_vm1 = vcmp.ge.f32.partialorder %v517_v31, 0.0 }
 0x168   :  { %v526_v53 = vadd.f32 %v1136_v40, %v504_v54  ;;  %v518_v55 = vadd.f32 %v1136_v40, %v496_v22  ;;  %v635_v35 = vsel %vm50_vm0, %v595_v52, 0.0  ;;  %v611_v7 = vsel %vm50_vm0, %v587_v20, 0.0 }
 0x169   :  { %633 = vadd.xlane.f32.xlu1 %v632_v4  ;;  %609 = vadd.xlane.f32.xlu0 %v608_v16  ;;  %v596_v34 = vmul.f32 %v580_v46, %v572_v45  ;;  %v588_v56 = vmul.f32 %v580_v46, %v564_v47  ;;  %v573_v57 = vsel %vm541_vm15, %v525_v51, %v557_v48  ;;  %v664_v25 = vand.u32 127, %v325_v27 }
 0x16a   :  { %v565_v60 = vsel %vm533_vm1, %v517_v31, %v549_v49  ;;  %v558_v61 = vmul.f32 0.2, %v526_v53  ;;  %v550_v62 = vmul.f32 0.2, %v518_v55  ;;  %vm542_vm2 = vcmp.ge.f32.partialorder %v526_v53, 0.0 }
 0x16b   :  { %vm534_vm3 = vcmp.ge.f32.partialorder %v518_v55, 0.0  ;;  %v638_v40 = vsel %vm50_vm0, %v596_v34, 0.0  ;;  %v614_v63 = vsel %vm50_vm0, %v588_v56, 0.0  ;;  %v597_v1 = vmul.f32 %v581_v58, %v573_v57 }
 0x16c   :  { %v589_v2 = vmul.f32 %v581_v58, %v565_v60  ;;  %v574_v3 = vsel %vm542_vm2, %v526_v53, %v558_v61  ;;  %v566_v6 = vsel %vm534_vm3, %v518_v55, %v550_v62  ;;  %v669_v29 = vadd.s32 4294967288, %v664_v25 }
 0x16d   :  { %636 = vadd.xlane.f32.xlu1 %v635_v35  ;;  %612 = vadd.xlane.f32.xlu0 %v611_v7  ;;  %v641_v8 = vsel %vm50_vm0, %v597_v1, 0.0  ;;  %v598_v10 = vmul.f32 %v582_v5, %v574_v3  ;;  %v590_v12 = vmul.f32 %v582_v5, %v566_v6  ;;  %v676_v0 = vadd.s32 4294967280, %v664_v25 }
 0x16e   :  { %v617_v9 = vsel %vm50_vm0, %v589_v2, 0.0  ;;  %v683_v32 = vadd.s32 4294967272, %v664_v25  ;;  %v690_v24 = vadd.s32 4294967264, %v664_v25  ;;  %v672_v38 = vsub.s32 %v669_v29, %v999_v33 }
 0x16f   :  { %v644_v13 = vsel %vm50_vm0, %v598_v10, 0.0  ;;  %v620_v15 = vsel %vm50_vm0, %v590_v12, 0.0  ;;  %v697_v41 = vadd.s32 4294967256, %v664_v25  ;;  %v679_v39 = vsub.s32 %v676_v0, %v999_v33 }
 0x170   :  { %v704_v36 = vadd.s32 4294967248, %v664_v25  ;;  %v667_v42 = vsub.s32 %v664_v25, %v999_v33  ;;  %v686_v11 = vsub.s32 %v683_v32, %v999_v33  ;;  %vm674_vm0 = vcmask 130112  }
 0x171   :  { %639 = vadd.xlane.f32.xlu1 %v638_v40  ;;  %615 = vadd.xlane.f32.xlu0 %v614_v63  ;;  %vm681_vm4 = vcmask 195712   ;;  %v693_v27 = vsub.s32 %v690_v24, %v999_v33  ;;  %v711_v14 = vadd.s32 4294967240, %v664_v25  ;;  %vm688_vm5 = vcmask 261312  }
 0x172   :  { %v700_v31 = vsub.s32 %v697_v41, %v999_v33  ;;  %vm695_vm6 = vcmask 326912   ;;  %v707_v52 = vsub.s32 %v704_v36, %v999_v33  ;;  %vm702_vm7 = vcmask 392512  }
 0x173   :  { %v714_v53 = vsub.s32 %v711_v14, %v999_v33  ;;  %vm709_vm8 = vcmask 458112   ;;  %vm716_vm9 = vcmask 523712   ;;  %vm757_vm10 = vcmask 1041409  }
 0x174   :  { %vm760_vm11 = vcmask 517120   ;;  %vm767_vm12 = vcmask 1024  }
 0x175   :  { %642 = vadd.xlane.f32.xlu1 %v641_v8  ;;  %618 = vadd.xlane.f32.xlu0 %v617_v9 }
 0x179   :  { %645 = vadd.xlane.f32.xlu1 %v644_v13  ;;  %621 = vadd.xlane.f32.xlu0 %v620_v15 }
 0x1e6   :  { %v625_v17 = vpop.xlane.xlu1 %624  ;;  %v601_v18 = vpop.xlane.xlu0 %600 }
 0x1e7   :  { %v721_v20 = vrot.slane %v625_v17, %v667_v42  ;;  %v668_v54 = vrot.slane %v601_v18, %v667_v42  ;;  %v765_v17 = vstv %s1254_s7 }
 0x1ea   :  { %v628_v19 = vpop.xlane.xlu1 %627  ;;  %v604_v21 = vpop.xlane.xlu0 %603 }
 0x1eb   :  { %v725_v44 = vrot.slane %v628_v19, %v672_v38  ;;  %v673_v51 = vrot.slane %v604_v21, %v672_v38 }
 0x1ed   :  { %v726_v55 = vsel %vm674_vm0, %v725_v44, %v721_v20  ;;  %v675_v35 = vsel %vm674_vm0, %v673_v51, %v668_v54 }
 0x1ee   :  { %v631_v59 = vpop.xlane.xlu1 %630  ;;  %v607_v23 = vpop.xlane.xlu0 %606 }
 0x1ef   :  { %v730_v4 = vrot.slane %v631_v59, %v679_v39  ;;  %v680_v16 = vrot.slane %v607_v23, %v679_v39 }
 0x1f1   :  { %v731_v56 = vsel %vm681_vm4, %v730_v4, %v726_v55  ;;  %v682_v57 = vsel %vm681_vm4, %v680_v16, %v675_v35 }
 0x1f2   :  { %v634_v28 = vpop.xlane.xlu1 %633  ;;  %v610_v26 = vpop.xlane.xlu0 %609 }
 0x1f3   :  { %v735_v22 = vrot.slane %v634_v28, %v686_v11  ;;  %v687_v45 = vrot.slane %v610_v26, %v686_v11 }
 0x1f5   :  { %v736_v61 = vsel %vm688_vm5, %v735_v22, %v731_v56  ;;  %v689_v62 = vsel %vm688_vm5, %v687_v45, %v682_v57 }
 0x1f6   :  { %v637_v37 = vpop.xlane.xlu1 %636  ;;  %v613_v30 = vpop.xlane.xlu0 %612 }
 0x1f7   :  { %v740_v46 = vrot.slane %v637_v37, %v693_v27  ;;  %v694_v47 = vrot.slane %v613_v30, %v693_v27 }
 0x1f9   :  { %v741_v40 = vsel %vm695_vm6, %v740_v46, %v736_v61  ;;  %v696_v33 = vsel %vm695_vm6, %v694_v47, %v689_v62 }
 0x1fa   :  { %v640_v50 = vpop.xlane.xlu1 %639  ;;  %v616_v43 = vpop.xlane.xlu0 %615 }
 0x1fb   :  { %v745_v7 = vrot.slane %v640_v50, %v700_v31  ;;  %v701_v34 = vrot.slane %v616_v43, %v700_v31 }
 0x1fd   :  { %v746_v2 = vsel %vm702_vm7, %v745_v7, %v741_v40  ;;  %v703_v3 = vsel %vm702_vm7, %v701_v34, %v696_v33 }
 0x1fe   :  { %v643_v48 = vpop.xlane.xlu1 %642  ;;  %v619_v49 = vpop.xlane.xlu0 %618 }
 0x1ff   :  { %v750_v58 = vrot.slane %v643_v48, %v707_v52  ;;  %v708_v60 = vrot.slane %v619_v49, %v707_v52 }
 0x201   :  { %v751_v8 = vsel %vm709_vm8, %v750_v58, %v746_v2  ;;  %v710_v9 = vsel %vm709_vm8, %v708_v60, %v703_v3 }
 0x202   :  { %v646_v63 = vpop.xlane.xlu1 %645  ;;  %v622_v1 = vpop.xlane.xlu0 %621 }
 0x203   :  { %v755_v5 = vrot.slane %v646_v63, %v714_v53  ;;  %v715_v6 = vrot.slane %v622_v1, %v714_v53 }
 0x205   :  { %v717_v10 = vsel %vm716_vm9, %v715_v6, %v710_v9  ;;  %v756_v12 = vsel %vm716_vm9, %v755_v5, %v751_v8 }
 0x206   :  { %v758_v13 = vsel %vm757_vm10, %v756_v12, %v717_v10 }
 0x207   :  { %v761_v15 = vsel %vm760_vm11, %v758_v13, 0.0 }
 0x208   :  { %762 = vadd.xlane.f32.xlu0 %v761_v15 }
 0x291   :  { %v763_v18 = vpop.xlane.xlu0 %762 }
 0x292   :  { %v766_v19 = vadd.f32 %v765_v17, %v763_v18 }
 0x294   :  { %768 = vst.msk [vmem:[%s1255_s8] sm:$0x3] %vm767_vm12, %v766_v19 }

</bundles_post_ra>
